<compile_context>
chip_gen: v6e
topology: v6e:2x2x1
jax: 0.10.0
libtpu: 0.0.40
codegen_flags: <defaults>
</compile_context>

<pallas_src>
import math
import functools

import jax
import jax.numpy as jnp
from jax.experimental import pallas as pl
from jax.experimental.pallas import tpu as pltpu


# ----------------------------------------------------------------------------
# Kernel: fused 3-layer MLP on one [TB, state_dim] batch tile.
#   x_ref  : [TB, S]  bf16      (streamed per grid step, native batch-major)
#   w*_ref : [out, in] bf16     (VMEM-resident across the batch grid)
#   b*_ref : [out, 1]  f32
#   out_ref: [A,  TB]  f32      (lane-dense store)
# ----------------------------------------------------------------------------
def _actor_kernel(x_ref, w1_ref, b1_ref, w2_ref, b2_ref, w3_ref, b3_ref,
                  out_ref, *, max_action):
    # Move batch onto lanes once, in-kernel (avoids a wrapper-side HBM
    # transpose round-trip of the whole input).
    x = x_ref[...].T                                    # [S, TB] bf16

    # Layer 1: [H,S] @ [S,TB] -> [H,TB], f32 accumulation on the MXU.
    h1 = jnp.dot(w1_ref[...], x, preferred_element_type=jnp.float32)
    h1 = jnp.maximum(h1 + b1_ref[...], 0.0)

    # Layer 2: [H,H] @ [H,TB] -> [H,TB]
    h2 = jnp.dot(w2_ref[...], h1.astype(w2_ref.dtype),
                 preferred_element_type=jnp.float32)
    h2 = jnp.maximum(h2 + b2_ref[...], 0.0)

    # Layer 3: [A,H] @ [H,TB] -> [A,TB], tanh (EUP) + scale.
    a = jnp.dot(w3_ref[...], h2.astype(w3_ref.dtype),
                preferred_element_type=jnp.float32)
    a = a + b3_ref[...]
    out_ref[...] = (max_action * jnp.tanh(a)).astype(out_ref.dtype)


# ----------------------------------------------------------------------------
# Batch-tile selection (perf review): amortize the ~0.35us/step pipeline
# overhead and MXU fill with a large lane tile, but keep >= 2 grid tiles for
# v7x dual-TC when the batch allows it.
# ----------------------------------------------------------------------------
def _choose_batch_tile(batch):
    tb = min(1024, pl.next_power_of_2(max(int(batch), 1)))
    tb = max(tb, 128)                       # lane width / (8,128) tiling
    if batch > 128 and pl.cdiv(batch, tb) < 2:
        tb = max(128, tb // 2)              # ensure >= 2 tiles for dual-TC
    return tb


# ----------------------------------------------------------------------------
# Wrapper
# ----------------------------------------------------------------------------
def actor_forward(state, params, max_action=1.0, batch_tile=None):
    """state: [B, state_dim] -> actions [B, action_dim] f32."""
    w1, b1, w2, b2, w3, b3 = (
        params["w1"], params["b1"], params["w2"], params["b2"],
        params["w3"], params["b3"],
    )
    B, S = state.shape
    H = w1.shape[0]
    A = w3.shape[0]

    TB = _choose_batch_tile(B) if batch_tile is None else int(batch_tile)
    n_tiles = pl.cdiv(B, TB)
    B_pad = n_tiles * TB

    # bf16 cast (halves streamed DMA bytes) + batch padding; padded rows are
    # zeros, flow through relu/tanh harmlessly and are sliced off at the end.
    # No transpose here -- the kernel transposes each tile on the XLU.
    x = jnp.pad(state.astype(jnp.bfloat16), ((0, B_pad - B), (0, 0)))

    # Weights / biases stay resident in VMEM across the whole batch grid.
    def resident(arr):
        return pl.BlockSpec(arr.shape, lambda i: (0, 0))

    nbytes = lambda a: a.size * a.dtype.itemsize

    # Advisory cost estimate for XLA scheduling around the custom call.
    flops = 2 * B_pad * (S * H + H * H + H * A)
    transcendentals = B_pad * A
    bytes_accessed = int(
        nbytes(x) + A * B_pad * 4
        + sum(nbytes(p) for p in (w1, b1, w2, b2, w3, b3)))

    # Explicit VMEM budget (v5e scoped default is only 16 MiB); stays <= the
    # 64 MiB physical VMEM of v7x.
    resident_bytes = 2 * sum(nbytes(p) for p in (w1, b1, w2, b2, w3, b3))
    stream_bytes = 2 * (TB * S * 2 + A * TB * 4)      # double-buffered x/out
    act_bytes = 4 * H * TB * 4                         # f32 intermediates
    vmem_limit = int(min(64 << 20,
                         max(32 << 20,
                             4 * (resident_bytes + stream_bytes + act_bytes))))

    kernel = functools.partial(_actor_kernel, max_action=float(max_action))

    out_t = pl.pallas_call(
        kernel,
        out_shape=jax.ShapeDtypeStruct((A, B_pad), jnp.float32),
        grid=(n_tiles,),
        in_specs=[
            pl.BlockSpec((TB, S), lambda i: (i, 0)),   # streamed x tile
            resident(w1), resident(b1),
            resident(w2), resident(b2),
            resident(w3), resident(b3),
        ],
        out_specs=pl.BlockSpec((A, TB), lambda i: (0, i)),   # lane-dense store
        compiler_params=pltpu.CompilerParams(
            dimension_semantics=("parallel",),          # dual-TC on v7x
            vmem_limit_bytes=vmem_limit),
        cost_estimate=pl.CostEstimate(
            flops=flops, transcendentals=transcendentals,
            bytes_accessed=bytes_accessed),
    )(x, w1, b1, w2, b2, w3, b3)

    # Match the PyTorch [B, A] output layout.  Callers that can consume
    # actions as [A, B] directly should take out_t[:, :B] and skip this.
    return out_t[:, :B].T


# ----------------------------------------------------------------------------
# Deterministic parameter initialization (mirrors Actor._initialize_weights).
# Weights in native PyTorch [out, in] layout, bf16; biases [out, 1] f32.
# ----------------------------------------------------------------------------
def init_actor_params(key, state_dim, action_dim, hidden_dim):
    k1, k2, k3, kb1, kb2, kb3 = jax.random.split(key, 6)

    def xavier_uniform(k, fan_in, fan_out):
        limit = math.sqrt(6.0 / (fan_in + fan_out))
        w = jax.random.uniform(k, (fan_out, fan_in), jnp.float32, -limit, limit)
        return w.astype(jnp.bfloat16)

    def linear_bias(k, fan_in, fan_out):
        # PyTorch default Linear bias init: U(-1/sqrt(fan_in), 1/sqrt(fan_in)).
        bound = 1.0 / math.sqrt(fan_in)
        return jax.random.uniform(k, (fan_out, 1), jnp.float32, -bound, bound)

    return {
        "w1": xavier_uniform(k1, state_dim, hidden_dim),
        "b1": linear_bias(kb1, state_dim, hidden_dim),
        "w2": xavier_uniform(k2, hidden_dim, hidden_dim),
        "b2": linear_bias(kb2, hidden_dim, hidden_dim),
        # l3 weight: uniform_(-0.003, 0.003); l3 bias keeps the PyTorch default.
        "w3": jax.random.uniform(k3, (action_dim, hidden_dim), jnp.float32,
                                 -0.003, 0.003).astype(jnp.bfloat16),
        "b3": linear_bias(kb3, hidden_dim, action_dim),
    }


# ----------------------------------------------------------------------------
# Pure-JAX reference (mirrors the kernel math, including bf16 casts).
# ----------------------------------------------------------------------------
def actor_reference(state, params, max_action=1.0):
    x = state.astype(jnp.bfloat16).T                       # [S, B]
    h1 = jnp.dot(params["w1"], x, preferred_element_type=jnp.float32)
    h1 = jnp.maximum(h1 + params["b1"], 0.0)
    h2 = jnp.dot(params["w2"], h1.astype(jnp.bfloat16),
                 preferred_element_type=jnp.float32)
    h2 = jnp.maximum(h2 + params["b2"], 0.0)
    a = jnp.dot(params["w3"], h2.astype(jnp.bfloat16),
                preferred_element_type=jnp.float32)
    return (max_action * jnp.tanh(a + params["b3"])).T     # [B, A]


# ----------------------------------------------------------------------------
# Main
# ----------------------------------------------------------------------------
if __name__ == "__main__":
    key = jax.random.PRNGKey(0)
    kp, kx = jax.random.split(key)

    batch = 8
    state_dim = 16
    action_dim = 8
    hidden_dim = 32
    max_action = 1.0

    params = init_actor_params(kp, state_dim, action_dim, hidden_dim)
    state = jax.random.normal(kx, (batch, state_dim), jnp.float32)

    actions = actor_forward(state, params, max_action=max_action)
    actions = jax.block_until_ready(actions)

    ref = actor_reference(state, params, max_action=max_action)

    assert actions.shape == (batch, action_dim), actions.shape
    err = float(jnp.max(jnp.abs(actions - ref)))
    assert jnp.allclose(actions, ref, atol=5e-3, rtol=1e-3), err
    print("KERNEL_OK")
</pallas_src>

<mosaic_0001>
module attributes {stable_mosaic.version = 11 : i64} {
  func.func @_actor_kernel(%arg0: i32, %arg1: memref<128x16xbf16, #tpu.memory_space<vmem>>, %arg2: memref<32x16xbf16, #tpu.memory_space<vmem>>, %arg3: memref<32x1xf32, #tpu.memory_space<vmem>>, %arg4: memref<32x32xbf16, #tpu.memory_space<vmem>>, %arg5: memref<32x1xf32, #tpu.memory_space<vmem>>, %arg6: memref<8x32xbf16, #tpu.memory_space<vmem>>, %arg7: memref<8x1xf32, #tpu.memory_space<vmem>>, %arg8: memref<8x128xf32, #tpu.memory_space<vmem>>) attributes {dimension_semantics = [#tpu.dimension_semantics<parallel>], iteration_bounds = array<i64: 1>, scalar_prefetch = 0 : i64, scratch_operands = 0 : i64, tpu.core_type = #tpu.core_type<tc>, window_params = [{transform_indices = @transform_0, window_bounds = array<i64: 128, 16>}, {pipeline_mode = #tpu.pipeline_mode<synchronous>, transform_indices = @transform_1, window_bounds = array<i64: 32, 16>}, {pipeline_mode = #tpu.pipeline_mode<synchronous>, transform_indices = @transform_2, window_bounds = array<i64: 32, 1>}, {pipeline_mode = #tpu.pipeline_mode<synchronous>, transform_indices = @transform_3, window_bounds = array<i64: 32, 32>}, {pipeline_mode = #tpu.pipeline_mode<synchronous>, transform_indices = @transform_4, window_bounds = array<i64: 32, 1>}, {pipeline_mode = #tpu.pipeline_mode<synchronous>, transform_indices = @transform_5, window_bounds = array<i64: 8, 32>}, {pipeline_mode = #tpu.pipeline_mode<synchronous>, transform_indices = @transform_6, window_bounds = array<i64: 8, 1>}, {transform_indices = @transform_7, window_bounds = array<i64: 8, 128>}]} {
    %c0 = arith.constant 0 : index
    %c0_0 = arith.constant 0 : index
    %0 = vector.load %arg1[%c0, %c0_0] : memref<128x16xbf16, #tpu.memory_space<vmem>>, vector<128x16xbf16>
    %1 = tpu.transpose %0, [1, 0] : vector<128x16xbf16> -> vector<16x128xbf16>
    %c0_1 = arith.constant 0 : index
    %c0_2 = arith.constant 0 : index
    %2 = vector.load %arg2[%c0_1, %c0_2] : memref<32x16xbf16, #tpu.memory_space<vmem>>, vector<32x16xbf16>
    %cst = arith.constant dense<0.000000e+00> : vector<32x128xf32>
    %3 = tpu.matmul %2, %1, %cst {dimension_numbers = #tpu.dot_dimension_numbers<[1], [0], [0], [1], [0, 0, 1, 1], [], []>} : vector<32x16xbf16>, vector<16x128xbf16>, vector<32x128xf32> -> vector<32x128xf32>
    %c0_3 = arith.constant 0 : index
    %c0_4 = arith.constant 0 : index
    %4 = vector.load %arg3[%c0_3, %c0_4] : memref<32x1xf32, #tpu.memory_space<vmem>>, vector<32x1xf32>
    %5 = vector.broadcast %4 : vector<32x1xf32> to vector<32x128xf32>
    %6 = arith.addf %3, %5 : vector<32x128xf32>
    %cst_5 = arith.constant 0.000000e+00 : f32
    %7 = vector.broadcast %cst_5 : f32 to vector<32x128xf32>
    %8 = arith.maximumf %6, %7 : vector<32x128xf32>
    %c0_6 = arith.constant 0 : index
    %c0_7 = arith.constant 0 : index
    %9 = vector.load %arg4[%c0_6, %c0_7] : memref<32x32xbf16, #tpu.memory_space<vmem>>, vector<32x32xbf16>
    %10 = arith.truncf %8 : vector<32x128xf32> to vector<32x128xbf16>
    %cst_8 = arith.constant dense<0.000000e+00> : vector<32x128xf32>
    %11 = tpu.matmul %9, %10, %cst_8 {dimension_numbers = #tpu.dot_dimension_numbers<[1], [0], [0], [1], [0, 0, 1, 1], [], []>} : vector<32x32xbf16>, vector<32x128xbf16>, vector<32x128xf32> -> vector<32x128xf32>
    %c0_9 = arith.constant 0 : index
    %c0_10 = arith.constant 0 : index
    %12 = vector.load %arg5[%c0_9, %c0_10] : memref<32x1xf32, #tpu.memory_space<vmem>>, vector<32x1xf32>
    %13 = vector.broadcast %12 : vector<32x1xf32> to vector<32x128xf32>
    %14 = arith.addf %11, %13 : vector<32x128xf32>
    %cst_11 = arith.constant 0.000000e+00 : f32
    %15 = vector.broadcast %cst_11 : f32 to vector<32x128xf32>
    %16 = arith.maximumf %14, %15 : vector<32x128xf32>
    %c0_12 = arith.constant 0 : index
    %c0_13 = arith.constant 0 : index
    %17 = vector.load %arg6[%c0_12, %c0_13] : memref<8x32xbf16, #tpu.memory_space<vmem>>, vector<8x32xbf16>
    %18 = arith.truncf %16 : vector<32x128xf32> to vector<32x128xbf16>
    %cst_14 = arith.constant dense<0.000000e+00> : vector<8x128xf32>
    %19 = tpu.matmul %17, %18, %cst_14 {dimension_numbers = #tpu.dot_dimension_numbers<[1], [0], [0], [1], [0, 0, 1, 1], [], []>} : vector<8x32xbf16>, vector<32x128xbf16>, vector<8x128xf32> -> vector<8x128xf32>
    %c0_15 = arith.constant 0 : index
    %c0_16 = arith.constant 0 : index
    %20 = vector.load %arg7[%c0_15, %c0_16] : memref<8x1xf32, #tpu.memory_space<vmem>>, vector<8x1xf32>
    %21 = vector.broadcast %20 : vector<8x1xf32> to vector<8x128xf32>
    %22 = arith.addf %19, %21 : vector<8x128xf32>
    %23 = math.tanh %22 : vector<8x128xf32>
    %cst_17 = arith.constant 1.000000e+00 : f32
    %24 = vector.broadcast %cst_17 : f32 to vector<8x128xf32>
    %25 = arith.mulf %24, %23 : vector<8x128xf32>
    %c0_18 = arith.constant 0 : index
    %c0_19 = arith.constant 0 : index
    %26 = vector.load %arg8[%c0_18, %c0_19] : memref<8x128xf32, #tpu.memory_space<vmem>>, vector<8x128xf32>
    tpu.vector_store %arg8[%c0_18, %c0_19], %25 {strides = array<i32>} : memref<8x128xf32, #tpu.memory_space<vmem>>, vector<8x128xf32>,
    return
  }
  func.func @transform_0(%arg0: i32) -> (i32, i32) {
    %c0_i32 = arith.constant 0 : i32
    %c0_i32_0 = arith.constant 0 : i32
    return %arg0, %c0_i32 : i32, i32
  }
  func.func @transform_1(%arg0: i32) -> (i32, i32) {
    %c0_i32 = arith.constant 0 : i32
    %c0_i32_0 = arith.constant 0 : i32
    %c0_i32_1 = arith.constant 0 : i32
    return %c0_i32, %c0_i32_0 : i32, i32
  }
  func.func @transform_2(%arg0: i32) -> (i32, i32) {
    %c0_i32 = arith.constant 0 : i32
    %c0_i32_0 = arith.constant 0 : i32
    %c0_i32_1 = arith.constant 0 : i32
    return %c0_i32, %c0_i32_0 : i32, i32
  }
  func.func @transform_3(%arg0: i32) -> (i32, i32) {
    %c0_i32 = arith.constant 0 : i32
    %c0_i32_0 = arith.constant 0 : i32
    %c0_i32_1 = arith.constant 0 : i32
    return %c0_i32, %c0_i32_0 : i32, i32
  }
  func.func @transform_4(%arg0: i32) -> (i32, i32) {
    %c0_i32 = arith.constant 0 : i32
    %c0_i32_0 = arith.constant 0 : i32
    %c0_i32_1 = arith.constant 0 : i32
    return %c0_i32, %c0_i32_0 : i32, i32
  }
  func.func @transform_5(%arg0: i32) -> (i32, i32) {
    %c0_i32 = arith.constant 0 : i32
    %c0_i32_0 = arith.constant 0 : i32
    %c0_i32_1 = arith.constant 0 : i32
    return %c0_i32, %c0_i32_0 : i32, i32
  }
  func.func @transform_6(%arg0: i32) -> (i32, i32) {
    %c0_i32 = arith.constant 0 : i32
    %c0_i32_0 = arith.constant 0 : i32
    %c0_i32_1 = arith.constant 0 : i32
    return %c0_i32, %c0_i32_0 : i32, i32
  }
  func.func @transform_7(%arg0: i32) -> (i32, i32) {
    %c0_i32 = arith.constant 0 : i32
    %c0_i32_0 = arith.constant 0 : i32
    return %c0_i32, %arg0 : i32, i32
  }
}

</mosaic_0001>

<bundles_post_ra>
// kernel: tpu_custom_call.1
= control target key start
LH: loop header
LB: loop body
LE: loop exit
PB: predicated region body
PF: predicated region fallthrough
CT: control target
= control target key end

     0   :  { %vm122_vm0 = vcmask 130048   ;;  %v494_v3 = vmov 0   ;;  %s628_s0 = inlined_call_operand.vmem [shape: bf16[128,16], index: 0, kind: input, shape index: {}]   ;;  %s629_s1 = inlined_call_operand.vmem [shape: bf16[32,16], index: 1, kind: input, shape index: {}]   ;;  %s630_s2 = inlined_call_operand.vmem [shape: f32[32,1], index: 2, kind: input, shape index: {}]   ;;  %s631_s3 = inlined_call_operand.vmem [shape: bf16[32,32], index: 3, kind: input, shape index: {}]   ;;  %s632_s4 = inlined_call_operand.vmem [shape: f32[32,1], index: 4, kind: input, shape index: {}]   ;;  %s633_s5 = inlined_call_operand.vmem [shape: bf16[8,32], index: 5, kind: input, shape index: {}]   ;;  %s634_s6 = inlined_call_operand.vmem [shape: f32[8,1], index: 6, kind: input, shape index: {}]   ;;  %s635_s7 = inlined_call_operand.hbm [shape: f32[8,128], index: 7, kind: output, shape index: {}]  }
   0x1   :  { %v458_v0 = vld [vmem:[%s628_s0 + $0x38] sm:$0xff]   ;;  %v459_v1 = vld [vmem:[%s628_s0 + $0x30] sm:$0xff]   ;;  %456 = vset.pattern.permute.xlu0 %v494_v3  ;;  %457 = vset.pattern.permute.xlu1 %v494_v3  ;;  %v460_v4 = vld [vmem:[%s628_s0 + $0x28] sm:$0xff]  }
   0x2   :  { %444 = vmatprep.subr.msk.bf16.mxu0 %vm122_vm0, %v458_v0  ;;  %v151_v2 = vsel %vm122_vm0, %v458_v0, 0  ;;  %v148_v5 = vsel %vm122_vm0, %v459_v1, 0  ;;  %v466_v6 = vld [vmem:[%s629_s1] sm:$0xff]   ;;  %v50_v7 = vld [vmem:[%s630_s2 + $0x10] sm:$0xff]  ;;  %v51_v9 = vld [vmem:[%s630_s2 + $0x18] sm:$0xff] }
   0x3   :  { %409 = vmatpush3.bf16.xpose.msra.mxu0 %v151_v2  ;;  %424 = vmatprep.mubr.msk.bf16.mxu0 %vm122_vm0, %v466_v6  ;;  %v48_v8 = vld [vmem:[%s630_s2] sm:$0xff]  ;;  %v49_v10 = vld [vmem:[%s630_s2 + $0x8] sm:$0xff] }
   0x4   :  { %445 = vmatprep.subr.msk.bf16.mxu0 %vm122_vm0, %v459_v1  ;;  %64 = vperm.xlu0 %456, %v50_v7  }
   0x5   :  { %54 = vperm.xlu1 %457, %v48_v8  }
   0xb   :  { %411 = vmatpush3.bf16.xpose.msra.mxu0 %v148_v5 }
   0xc   :  { %446 = vmatprep.subr.msk.bf16.mxu0 %vm122_vm0, %v460_v4 }
   0xd   :  { %12 = vsyncpa [#allocation3], 0  ;;  %69 = vperm.xlu0 %456, %v51_v9   ;;  %v145_v11 = vsel %vm122_vm0, %v460_v4, 0  ;;  %v461_v12 = vld [vmem:[%s628_s0 + $0x20] sm:$0xff]   ;;  %v214_v13 = vld [vmem:[%s632_s4 + $0x10] sm:$0xff]  ;;  %59 = vperm.xlu1 %457, %v49_v10   ;;  %vm246_vm1 = vcmask 261120  }
   0xe   :  { %v215_v14 = vld [vmem:[%s632_s4 + $0x18] sm:$0xff]  ;;  %v212_v15 = vld [vmem:[%s632_s4] sm:$0xff]  ;;  %v213_v16 = vld [vmem:[%s632_s4 + $0x8] sm:$0xff]  ;;  %v142_v17 = vsel %vm122_vm0, %v461_v12, 0  ;;  %v495_v48 = vmov 0.0   ;;  %vm496_vm2 = vmmov 0  }
   0xf   :  { %v462_v18 = vld [vmem:[%s628_s0 + $0x18] sm:$0xff]   ;;  %v309_v19 = vld [vmem:[%s634_s6] sm:$0xff]  ;;  %v463_v21 = vld [vmem:[%s628_s0 + $0x10] sm:$0xff]   ;;  %s497_s16 = smov [#allocation2]  }
  0x10   :  { %v139_v20 = vsel %vm122_vm0, %v462_v18, 0  ;;  %v136_v22 = vsel %vm122_vm0, %v463_v21, 0  ;;  %v464_v23 = vld [vmem:[%s628_s0 + $0x8] sm:$0xff]   ;;  %v465_v25 = vld [vmem:[%s628_s0] sm:$0xff]   ;;  %s366_s17 = sshll.u32 %s497_s16, 4  ;;  %s367_s17 = int_to_ptr.vmem [resolvable:$true] %s366_s17 }
  0x11   :  { %228 = vperm.xlu0 %456, %v214_v13   ;;  %233 = vperm.xlu1 %457, %v215_v14   ;;  %v133_v24 = vsel %vm122_vm0, %v464_v23, 0  ;;  %v130_v26 = vsel %vm122_vm0, %v465_v25, 0  ;;  %v467_v27 = vld [vmem:[%s629_s1 + $0x8] sm:$0xff]   ;;  %v468_v28 = vld [vmem:[%s631_s3] sm:$0xff]   ;;  %s472_s18 = scalar_lea.vmem %s367_s17, 128  ;;  %p477_p1 = scmp.lt.s32.totalorder %s367_s17, %s367_s17 }
  0x12   :  { %432 = vmatprep.mubr.msk.bf16.mxu1 %vm246_vm1, %v468_v28  ;;  %v469_v47 = vld [vmem:[%s631_s3 + $0x8] sm:$0xff]   ;;  %v306_v3 = vld [vmem:[%s633_s5] sm:$0xf]  ;;  %p473_p0 = scmp.ne.s32.totalorder %s367_s17, %s472_s18  ;;  %p478_p2 = scmp.lt.s32.totalorder %s472_s18, %s472_s18 }
  0x13   :  { %413 = vmatpush3.bf16.xpose.msra.mxu0 %v145_v11 }
  0x14   :  { %447 = vmatprep.subr.msk.bf16.mxu0 %vm122_vm0, %v461_v12  ;;  %p479_p3 = por %p478_p2, %p477_p1 }
  0x15   :  { %218 = vperm.xlu0 %456, %v212_v15   ;;  %223 = vperm.xlu1 %457, %v213_v16  }
  0x16   :  { %p480_p4 = pnand %p479_p3, %p473_p0 }
  0x19   :  { %312 = vperm.xlu0 %456, %v309_v19  }
  0x1b   :  { %415 = vmatpush3.bf16.xpose.msra.mxu0 %v142_v17 }
  0x1c   :  { %448 = vmatprep.subr.msk.bf16.mxu0 %vm122_vm0, %v462_v18 }
  0x23   :  { %417 = vmatpush3.bf16.xpose.msra.mxu0 %v139_v20 }
  0x24   :  { %449 = vmatprep.subr.msk.bf16.mxu0 %vm122_vm0, %v463_v21 }
  0x2b   :  { %419 = vmatpush3.bf16.xpose.msra.mxu0 %v136_v22 }
  0x2c   :  { %450 = vmatprep.subr.msk.bf16.mxu0 %vm122_vm0, %v464_v23 }
  0x33   :  { %421 = vmatpush3.bf16.xpose.msra.mxu0 %v133_v24 }
  0x34   :  { %451 = vmatprep.subr.msk.bf16.mxu0 %vm122_vm0, %v465_v25 }
  0x3b   :  { %423 = vmatpush3.bf16.xpose.msra.mxu0 %v130_v26 }
  0x42   :  { %425 = vmatmul.mubr.msk.bf16.vlgmr.msra.gmra.mxu0 %vm122_vm0, %v467_v27 }
  0x7f   :  { %v65_v29 = vpop.permute.xlu0 %64 }
  0x80   :  { %v55_v30 = vpop.permute.xlu1 %54 }
  0x88   :  { %v70_v34 = vpop.permute.xlu0 %69  ;;  %v60_v38 = vpop.permute.xlu1 %59 }
  0x8c   :  { %v229_v49 = vpop.permute.xlu0 %228  ;;  %v234_v50 = vpop.permute.xlu1 %233 }
  0x90   :  { %v219_v55 = vpop.permute.xlu0 %218  ;;  %v224_v57 = vpop.permute.xlu1 %223 }
  0x94   :  { %v313_v4 = vpop.permute.xlu0 %312 }
 0x102   :  { %v426_v31 = vpop.f32.mrf.mxu0 }
 0x103   :  { %v196_v33 = vadd.f32 %v426_v31, %v65_v29 }
 0x104   :  { %v187_v32 = vpop.f32.mrf.mxu0 }
 0x105   :  { %v188_v36 = vadd.f32 %v187_v32, %v55_v30  ;;  %v204_v40 = vmax.f32 %v196_v33, 0.0 }
 0x106   :  { %v427_v35 = vpop.f32.mrf.mxu0 }
 0x107   :  { %v199_v37 = vadd.f32 %v427_v35, %v70_v34  ;;  %v202_v43 = vmax.f32 %v188_v36, 0.0 }
 0x108   :  { %v190_v39 = vpop.f32.mrf.mxu0 }
 0x109   :  { %v205_v41 = vmax.f32 %v199_v37, 0.0  ;;  %v191_v42 = vadd.f32 %v190_v39, %v60_v38 }
 0x10b   :  { %v203_v44 = vmax.f32 %v191_v42, 0.0  ;;  %v211_v45 = vpack.c.bf16 %v205_v41, %v204_v40 }
 0x10d   :  { %v210_v46 = vpack.c.bf16 %v203_v44, %v202_v43  ;;  %428 = vmatprep.subr.bf16.mxu1 %v211_v45 }
 0x10e   :  { %429 = vmatpush3.bf16.msra.mxu1 %v211_v45 }
 0x10f   :  { %430 = vmatprep.subr.bf16.mxu1 %v210_v46 }
 0x112   :  { %431 = vmatpush3.bf16.msra.mxu1 %v210_v46 }
 0x113   :  { %436 = vmatprep.subr.bf16.mxu1 %v495_v48 }
 0x115   :  { %433 = vmatmul.mubr.msk.bf16.vlgmr.msra.gmra.mxu1 %vm246_vm1, %v469_v47 }
 0x116   :  { %440 = vmatprep.mubr.msk.bf16.mxu1 %vm496_vm2, %v495_v48 }
 0x1d5   :  { %v434_v51 = vpop.f32.mrf.mxu1 }
 0x1d6   :  { %v296_v53 = vadd.f32 %v434_v51, %v229_v49 }
 0x1d7   :  { %v287_v52 = vpop.f32.mrf.mxu1 }
 0x1d8   :  { %v304_v59 = vmax.f32 %v296_v53, 0.0  ;;  %v288_v60 = vadd.f32 %v287_v52, %v219_v55 }
 0x1d9   :  { %v435_v54 = vpop.f32.mrf.mxu1 }
 0x1da   :  { %v299_v56 = vadd.f32 %v435_v54, %v234_v50  ;;  %v302_v1 = vmax.f32 %v288_v60, 0.0 }
 0x1db   :  { %v290_v58 = vpop.f32.mrf.mxu1 }
 0x1dc   :  { %v305_v61 = vmax.f32 %v299_v56, 0.0  ;;  %v291_v62 = vadd.f32 %v290_v58, %v224_v57 }
 0x1de   :  { %v308_v63 = vpack.c.bf16 %v305_v61, %v304_v59  ;;  %v303_v0 = vmax.f32 %v291_v62, 0.0 }
 0x1e0   :  { %437 = vmatpush3.bf16.msra.mxu1 %v308_v63  ;;  %v307_v2 = vpack.c.bf16 %v303_v0, %v302_v1 }
 0x1e1   :  { %438 = vmatprep.subr.bf16.mxu1 %v495_v48 }
 0x1e4   :  { %439 = vmatpush3.bf16.msra.mxu1 %v307_v2 }
 0x1e7   :  { %441 = vmatmul.mubr.msk.bf16.vlgmr.msra.gmra.mxu1 %vm246_vm1, %v306_v3 }
 0x2a7   :  { %v352_v5 = vpop.f32.mrf.mxu1 }
 0x2a8   :  { %v353_v6 = vadd.f32 %v352_v5, %v313_v4 }
 0x2a9   :  { %v442_v7 = vpop.f32.mrf.mxu1 }
 0x2aa   :  { %470 = vtanh.f32 %v353_v6 }
 0x2ab   :  { %v355_v8 = vpop.f32.mrf.mxu1 }
 0x2ad   :  { %v443_v9 = vpop.f32.mrf.mxu1 }
 0x2b7   :  { %v471_v10 = vpop.eup %470 }
 0x2b8   :  { %359 = vst [vmem:[#allocation2] sm:$0xff] %v471_v10 }
 0x2b9   :  { %483 = shalt.err (!%p480_p4)
}
 0x2ba   :  { %369 = dma.vmem_to_hbm [thread:$0]  %s367_s17, 128, %s635_s7, [#allocation3]  }
 0x2bb   :  { %492 = dma.done.wait [#allocation3], 128  }
 0x2bc   :  { %493 = vsyncadd [#allocation3], 4294967168 }
 0x2bd   :  { %373 = vsyncpa [#allocation3], 1 }

</bundles_post_ra>
